<compile_context>
chip_gen: v7x
topology: tpu7x:2x2x1
jax: 0.10.0
libtpu: 0.0.40
codegen_flags: <defaults>
</compile_context>

<pallas_src>
import functools

import jax
import jax.numpy as jnp
from jax.experimental import pallas as pl
from jax.experimental.pallas import tpu as pltpu

_MIN_CH = 128                       # lane-dense channel floor
_VMEM_LIMIT = 32 * 1024 * 1024      # explicit scoped-VMEM budget (v7x-safe)


def _round_up(v, m):
    return (v + m - 1) // m * m


def _pick_tk(K, cap=1024):
    """Largest multiple-of-128 divisor of K (<= cap); K itself if unaligned."""
    if K % 128 != 0:
        return K
    for t in range(min(cap, K), 0, -128):
        if K % t == 0:
            return t
    return K


def _pick_tn(N, cap=512):
    if N % 128 != 0:
        return N                    # only the tiny fc head (num_classes)
    for t in range(min(cap, N), 0, -128):
        if N % t == 0:
            return t
    return N


def _pick_tm(M, cap=512):
    return min(cap, _round_up(M, 16))     # bf16-friendly (16-sublane) rows


def _pick_cblock(C, cap=512):
    for t in range(min(cap, C), 0, -128):
        if C % t == 0:
            return t
    return C


def _mosaic_params(sem):
    return pltpu.CompilerParams(dimension_semantics=sem,
                                vmem_limit_bytes=_VMEM_LIMIT)


# ----------------------------------------------------------------------------
# Pallas kernels
# ----------------------------------------------------------------------------
@functools.lru_cache(maxsize=None)
def _make_mm_kernel(relu: bool, has_res: bool):
    """(M,N,K)-tiled: acc += x@w ; epilogue scale/bias[/res][/relu] + cast."""
    def kernel(*refs):
        if has_res:
            x_ref, w_ref, s_ref, b_ref, r_ref, o_ref, acc_ref = refs
        else:
            x_ref, w_ref, s_ref, b_ref, o_ref, acc_ref = refs
            r_ref = None

        @pl.when(pl.program_id(2) == 0)
        def _():
            acc_ref[...] = jnp.zeros_like(acc_ref)

        acc_ref[...] += jnp.dot(x_ref[...], w_ref[...],
                                preferred_element_type=jnp.float32)

        @pl.when(pl.program_id(2) == pl.num_programs(2) - 1)
        def _():
            y = acc_ref[...] * s_ref[...] + b_ref[...]
            if has_res:
                y = y + r_ref[...].astype(jnp.float32)
            if relu:
                y = jnp.maximum(y, 0.0)
            o_ref[...] = y.astype(o_ref.dtype)

    return kernel


@functools.lru_cache(maxsize=None)
def _make_conv3x3_kernel(relu: bool, Ho: int, Wo: int, Wp: int):
    """Direct 3x3 / stride-1 / pad-1 conv: 9 statically-offset row windows of
    the flattened padded plane (no HBM im2col), cin streamed on grid axis 2."""
    M_wide = Ho * Wp

    def kernel(x_ref, w_ref, s_ref, b_ref, o_ref, acc_ref):
        @pl.when(pl.program_id(2) == 0)
        def _():
            acc_ref[...] = jnp.zeros_like(acc_ref)

        for di in range(3):
            for dj in range(3):
                start = di * Wp + dj
                lhs = x_ref[0, start:start + M_wide, :]      # (M_wide, tci)
                acc_ref[...] += jnp.dot(lhs, w_ref[di, dj],
                                        preferred_element_type=jnp.float32)

        @pl.when(pl.program_id(2) == pl.num_programs(2) - 1)
        def _():
            y = acc_ref[...] * s_ref[...] + b_ref[...]
            if relu:
                y = jnp.maximum(y, 0.0)
            y = y.reshape(Ho, Wp, -1)[:, :Wo, :]    # drop the width halo cols
            o_ref[0] = y.astype(o_ref.dtype)

    return kernel


def _attention_kernel(th_ref, ph_ref, g_ref, o_ref):
    """Embedded-Gaussian non-local attention for one (batch, query-tile)."""
    th = th_ref[0]                       # (tq, C') bf16
    ph = ph_ref[0]                       # (L,  C') bf16 (NOT pre-transposed)
    g = g_ref[0]                         # (L,  C') bf16
    # f = th @ ph^T as an NT contraction on the MXU (no HBM transpose of phi)
    f = jax.lax.dot_general(th, ph, (((1,), (1,)), ((), ())),
                            preferred_element_type=jnp.float32)   # (tq, L)
    f = f - jnp.max(f, axis=-1, keepdims=True)
    p = jnp.exp(f)
    p = p * pl.reciprocal(jnp.sum(p, axis=-1, keepdims=True), approx=True)
    o_ref[0] = jnp.dot(p.astype(jnp.bfloat16), g,
                       preferred_element_type=jnp.float32).astype(o_ref.dtype)


def _max9_kernel(*refs):
    """Elementwise max over 9 shifted pooling windows (lane-dense on C)."""
    *in_refs, o_ref = refs
    m = in_refs[0][...]
    for r in in_refs[1:]:
        m = jnp.maximum(m, r[...])
    o_ref[...] = m


def _gap_kernel(x_ref, o_ref):
    o_ref[...] = jnp.mean(x_ref[...].astype(jnp.float32), axis=1)


# ----------------------------------------------------------------------------
# Pallas wrappers
# ----------------------------------------------------------------------------
def _matmul_bn_act(x, w, scale, bias, residual=None, relu=True,
                   out_dtype=jnp.bfloat16):
    """x:(M,K) w:(K,N) scale/bias:(N,) residual:(M,N)|None -> (M,N)."""
    x = x.astype(jnp.bfloat16)
    w = w.astype(jnp.bfloat16)
    M, K = x.shape
    N = w.shape[1]

    # Keep K lane-aligned (zero rows/cols are FLOP-free); only conv1's
    # im2col K=147 hits this after channel padding.
    if K % 128 != 0 and K > 128:
        Kp = _round_up(K, 128)
        x = jnp.pad(x, ((0, 0), (0, Kp - K)))
        w = jnp.pad(w, ((0, Kp - K), (0, 0)))
        K = Kp

    scale = scale.astype(jnp.float32).reshape(1, N)
    bias = bias.astype(jnp.float32).reshape(1, N)

    tm = _pick_tm(M)
    tk = _pick_tk(K)
    tn = _pick_tn(N)

    # Only tiny matrices (M < tm) are padded; larger ragged M is handled by a
    # cdiv grid with a masked partial last tile (no HBM copy of activations).
    if M < tm:
        x = jnp.pad(x, ((0, tm - M), (0, 0)))
        if residual is not None:
            residual = jnp.pad(residual, ((0, tm - M), (0, 0)))
        M_eff = tm
    else:
        M_eff = M

    grid = (pl.cdiv(M_eff, tm), N // tn, K // tk)

    # Note: scale/bias/residual block indices are constant across the k axis,
    # so Pallas only DMAs them once per (i, j); the duplicate pipeline buffer
    # they cost is negligible against the 32 MiB VMEM budget.
    in_specs = [
        pl.BlockSpec((tm, tk), lambda i, j, k: (i, k)),
        pl.BlockSpec((tk, tn), lambda i, j, k: (k, j)),
        pl.BlockSpec((1, tn), lambda i, j, k: (0, j)),
        pl.BlockSpec((1, tn), lambda i, j, k: (0, j)),
    ]
    args = [x, w, scale, bias]
    if residual is not None:
        args.append(residual.astype(jnp.bfloat16))
        in_specs.append(pl.BlockSpec((tm, tn), lambda i, j, k: (i, j)))

    out = pl.pallas_call(
        _make_mm_kernel(relu, residual is not None),
        out_shape=jax.ShapeDtypeStruct((M_eff, N), out_dtype),
        grid=grid,
        in_specs=in_specs,
        out_specs=pl.BlockSpec((tm, tn), lambda i, j, k: (i, j)),
        scratch_shapes=[pltpu.VMEM((tm, tn), jnp.float32)],
        compiler_params=_mosaic_params(("parallel", "parallel", "arbitrary")),
    )(*args)
    return out[:M]


def _conv3x3_s1_direct(x, w, scale, bias, *, relu=True):
    """3x3 / stride-1 / pad-1 conv + folded BN (+ReLU) without HBM im2col."""
    B, H, W, C = x.shape
    cout = w.shape[-1]
    Ho, Wo = H, W
    Wp = _round_up(W + 2, 8)             # 8-aligned padded width
    Hp = H + 3                           # 1 top halo + >=2 bottom halo rows
    xp = jnp.pad(x.astype(jnp.bfloat16),
                 ((0, 0), (1, Hp - H - 1), (1, Wp - W - 1), (0, 0)))
    xf = xp.reshape(B, Hp * Wp, C)       # contiguous -> layout no-op
    M_wide = Ho * Wp

    tci = _pick_cblock(C)
    tco = _pick_cblock(cout)
    grid = (B, cout // tco, C // tci)

    return pl.pallas_call(
        _make_conv3x3_kernel(relu, Ho, Wo, Wp),
        out_shape=jax.ShapeDtypeStruct((B, Ho, Wo, cout), jnp.bfloat16),
        grid=grid,
        in_specs=[
            pl.BlockSpec((1, Hp * Wp, tci), lambda b, n, k: (b, 0, k)),
            pl.BlockSpec((3, 3, tci, tco), lambda b, n, k: (0, 0, k, n)),
            pl.BlockSpec((1, tco), lambda b, n, k: (0, n)),
            pl.BlockSpec((1, tco), lambda b, n, k: (0, n)),
        ],
        out_specs=pl.BlockSpec((1, Ho, Wo, tco), lambda b, n, k: (b, 0, 0, n)),
        scratch_shapes=[pltpu.VMEM((M_wide, tco), jnp.float32)],
        compiler_params=_mosaic_params(("parallel", "parallel", "arbitrary")),
    )(xf, w.astype(jnp.bfloat16),
      scale.astype(jnp.float32).reshape(1, cout),
      bias.astype(jnp.float32).reshape(1, cout))


@functools.partial(jax.jit, static_argnames=("stride", "padding", "relu"))
def conv_bn_act(x, w, scale, bias, residual=None, *, stride=1, padding=0,
                relu=True):
    """NHWC conv (weights (kh,kw,cin,cout)) + folded BN + opt residual/ReLU."""
    kh, kw, cin, cout = w.shape

    # Hot path: every stride-1 3x3 bottleneck conv streams taps directly.
    if (kh == 3 and kw == 3 and stride == 1 and padding == 1
            and residual is None and cin % 128 == 0 and cout % 128 == 0):
        return _conv3x3_s1_direct(x, w, scale, bias, relu=relu)

    # Fallback (1x1 convs, conv1 7x7, the three stride-2 3x3s): im2col matmul.
    B = x.shape[0]
    x = x.astype(jnp.bfloat16)
    if padding:
        x = jnp.pad(x, ((0, 0), (padding, padding), (padding, padding), (0, 0)))
    Hp, Wp = x.shape[1], x.shape[2]
    Ho = (Hp - kh) // stride + 1
    Wo = (Wp - kw) // stride + 1
    if kh == 1 and kw == 1 and stride == 1:
        patches = x                          # 1x1: no im2col at all
    else:
        cols = []
        for i in range(kh):
            for j in range(kw):
                cols.append(x[:, i:i + stride * (Ho - 1) + 1:stride,
                              j:j + stride * (Wo - 1) + 1:stride, :])
        patches = jnp.concatenate(cols, axis=-1) if len(cols) > 1 else cols[0]
    xm = patches.reshape(B * Ho * Wo, kh * kw * cin)
    wm = w.reshape(kh * kw * cin, cout)
    rm = None if residual is None else residual.reshape(B * Ho * Wo, cout)
    out = _matmul_bn_act(xm, wm, scale, bias, residual=rm, relu=relu)
    return out.reshape(B, Ho, Wo, cout)


def maxpool_3x3_s2_p1(x):
    # TODO(synk): read the padded plane once per tile and do the 9-way max
    # in-kernel (strided in-VMEM windows) to cut HBM traffic from ~9x to ~2x.
    B, H, W, C = x.shape
    x = x.astype(jnp.bfloat16)
    xp = jnp.pad(x, ((0, 0), (1, 1), (1, 1), (0, 0)),
                 constant_values=-jnp.inf)
    Ho = (H + 2 - 3) // 2 + 1
    Wo = (W + 2 - 3) // 2 + 1
    M = B * Ho * Wo
    views = []
    for i in range(3):
        for j in range(3):
            views.append(xp[:, i:i + 2 * (Ho - 1) + 1:2,
                            j:j + 2 * (Wo - 1) + 1:2, :].reshape(M, C))
    tm = M
    for cand in (512, 256, 128, 64, 32, 16, 8):
        if M % cand == 0:
            tm = cand
            break
    out = pl.pallas_call(
        _max9_kernel,
        out_shape=jax.ShapeDtypeStruct((M, C), jnp.bfloat16),
        grid=(M // tm,),
        in_specs=[pl.BlockSpec((tm, C), lambda i: (i, 0))] * 9,
        out_specs=pl.BlockSpec((tm, C), lambda i: (i, 0)),
        compiler_params=pltpu.CompilerParams(
            dimension_semantics=("parallel",)),
    )(*views)
    return out.reshape(B, Ho, Wo, C)


def global_avg_pool(x):
    B, H, W, C = x.shape
    xr = x.reshape(B, H * W, C).astype(jnp.bfloat16)
    # Single whole-array step: the (B, H*W, C) block is a few hundred KB.
    return pl.pallas_call(
        _gap_kernel,
        out_shape=jax.ShapeDtypeStruct((B, C), jnp.float32),
    )(xr)


def nonlocal_block(x, p):
    """Embedded-Gaussian non-local block: z = BN(W(y)) + x."""
    B, H, W, C = x.shape
    inter = p['theta_w'].shape[-1]
    ones = jnp.ones((inter,), jnp.float32)
    th = conv_bn_act(x, p['theta_w'], ones, p['theta_b'], relu=False)
    ph = conv_bn_act(x, p['phi_w'], ones, p['phi_b'], relu=False)
    g = conv_bn_act(x, p['g_w'], ones, p['g_b'], relu=False)
    L = H * W
    th = th.reshape(B, L, inter)
    ph = ph.reshape(B, L, inter)          # no HBM transpose of phi
    g = g.reshape(B, L, inter)
    tq = 128 if L % 128 == 0 else L
    y = pl.pallas_call(
        _attention_kernel,
        out_shape=jax.ShapeDtypeStruct((B, L, inter), jnp.bfloat16),
        grid=(B, L // tq),
        in_specs=[
            pl.BlockSpec((1, tq, inter), lambda b, q: (b, q, 0)),
            pl.BlockSpec((1, L, inter), lambda b, q: (b, 0, 0)),
            pl.BlockSpec((1, L, inter), lambda b, q: (b, 0, 0)),
        ],
        out_specs=pl.BlockSpec((1, tq, inter), lambda b, q: (b, q, 0)),
        compiler_params=pltpu.CompilerParams(
            dimension_semantics=("parallel", "parallel")),
    )(th, ph, g)
    y = y.reshape(B, H, W, inter)
    # W: 1x1 conv + BN, residual add, no ReLU.
    return conv_bn_act(y, p['W_w'], p['W_s'], p['W_b'], residual=x, relu=False)


def bottleneck(x, p):
    stride = p['stride']
    identity = x
    out = conv_bn_act(x, p['w1'], p['s1'], p['b1'],
                      stride=1, padding=0, relu=True)
    out = conv_bn_act(out, p['w2'], p['s2'], p['b2'],
                      stride=stride, padding=1, relu=True)
    if 'wd' in p:
        identity = conv_bn_act(x, p['wd'], p['sd'], p['bd'],
                               stride=stride, padding=0, relu=False)
    out = conv_bn_act(out, p['w3'], p['s3'], p['b3'], residual=identity,
                      stride=1, padding=0, relu=True)
    return out


# ----------------------------------------------------------------------------
# Parameter construction (deterministic, synthetic)
# ----------------------------------------------------------------------------
_BN_EPS = 1e-5


def _bn_fold(gamma, beta, mean, var, eps=_BN_EPS):
    scale = gamma / jnp.sqrt(var + eps)
    return scale, beta - mean * scale


def _bn_params(c):
    # inference-mode BN with gamma=1, beta=0, running_mean=0, running_var=1
    return _bn_fold(jnp.ones((c,), jnp.float32), jnp.zeros((c,), jnp.float32),
                    jnp.zeros((c,), jnp.float32), jnp.ones((c,), jnp.float32))


def _pad_filters(w, cin_p, cout_p):
    """Zero-pad conv filters to lane-dense channel counts (>=128)."""
    kh, kw, cin, cout = w.shape
    return jnp.pad(w, ((0, 0), (0, 0), (0, cin_p - cin), (0, cout_p - cout)))


def _pad_affine(scale, bias, cout_p):
    pad = cout_p - scale.shape[0]
    if pad <= 0:
        return scale, bias
    return (jnp.pad(scale, (0, pad), constant_values=1.0),
            jnp.pad(bias, (0, pad)))


class _KeyGen:
    def __init__(self, key):
        self._key = key
        self._i = 0

    def __call__(self):
        self._i += 1
        return jax.random.fold_in(self._key, self._i)


def _he(key, shape, gain=1.0):
    kh, kw, cin, _ = shape
    fan_in = kh * kw * cin
    w = gain * jax.random.normal(key, shape, jnp.float32) * jnp.sqrt(2.0 / fan_in)
    return w.astype(jnp.bfloat16)


def _make_bottleneck(kg, inplanes, planes, stride, in_ch):
    exp = 4
    planes_p = max(planes, _MIN_CH)       # lane-dense internal width
    out_ch = planes * exp                 # >= 256, never padded
    p = {'stride': stride}
    p['w1'] = _pad_filters(_he(kg(), (1, 1, inplanes, planes)), in_ch, planes_p)
    p['s1'], p['b1'] = _pad_affine(*_bn_params(planes), planes_p)
    p['w2'] = _pad_filters(_he(kg(), (3, 3, planes, planes)), planes_p, planes_p)
    p['s2'], p['b2'] = _pad_affine(*_bn_params(planes), planes_p)
    # last conv scaled down (mimics zero-init-last-BN) to keep 50 stacked
    # residual blocks numerically tame with random weights.
    p['w3'] = _pad_filters(_he(kg(), (1, 1, planes, out_ch), gain=0.1),
                           planes_p, out_ch)
    p['s3'], p['b3'] = _bn_params(out_ch)
    if stride != 1 or inplanes != out_ch:
        p['wd'] = _pad_filters(_he(kg(), (1, 1, inplanes, out_ch)),
                               in_ch, out_ch)
        p['sd'], p['bd'] = _bn_params(out_ch)
    return p, out_ch


def make_params(key, num_classes=3):
    kg = _KeyGen(key)
    params = {}
    # conv1: cout 64 -> padded to 128 (extra filters are zero, BN bias 0),
    # so every activation/output tile in the network is >=128 lanes wide.
    params['conv1_w'] = _pad_filters(_he(kg(), (7, 7, 3, 64)), 3, _MIN_CH)
    s1, b1 = _bn_params(64)
    params['bn1_s'], params['bn1_b'] = _pad_affine(s1, b1, _MIN_CH)

    stages = [(64, 3, 1), (128, 8, 2), (256, 36, 2), (512, 3, 2)]  # ResNet-152
    inplanes = 64
    in_ch = _MIN_CH                     # actual (padded) channels of the input
    layers = []
    for planes, nblocks, stride in stages:
        blocks = []
        for bi in range(nblocks):
            s = stride if bi == 0 else 1
            bp, out_ch = _make_bottleneck(kg, inplanes, planes, s, in_ch)
            blocks.append(bp)
            inplanes = planes * 4
            in_ch = out_ch
        layers.append(blocks)
    params['layers'] = layers

    # non-local block appended after stage 3 (C = 1024, inter = 512)
    c = 1024
    inter = c // 2
    nl = {}
    for name in ('theta', 'phi', 'g'):
        nl[name + '_w'] = _he(kg(), (1, 1, c, inter))
        nl[name + '_b'] = jnp.zeros((inter,), jnp.float32)
    nl['W_w'] = _he(kg(), (1, 1, inter, c), gain=0.1)
    nl['W_s'], nl['W_b'] = _bn_params(c)
    params['nonlocal'] = nl

    params['fc_w'] = (jax.random.normal(kg(), (512 * 4, num_classes),
                                        jnp.float32) / jnp.sqrt(512 * 4))
    params['fc_b'] = jnp.zeros((num_classes,), jnp.float32)
    return params


# ----------------------------------------------------------------------------
# Full forward pass
# ----------------------------------------------------------------------------
def nonlocal_resnet152_forward(params, x_nchw, risk_factors=None, batch=None):
    del risk_factors, batch   # unused (default call path of the module)
    x = jnp.transpose(x_nchw, (0, 2, 3, 1)).astype(jnp.bfloat16)  # NCHW->NHWC
    x = conv_bn_act(x, params['conv1_w'], params['bn1_s'], params['bn1_b'],
                    stride=2, padding=3, relu=True)
    x = maxpool_3x3_s2_p1(x)
    for li, blocks in enumerate(params['layers']):
        for bp in blocks:
            x = bottleneck(x, bp)
        if li == 2:                       # NonLocalBlock after the 36 blocks
            x = nonlocal_block(x, params['nonlocal'])
    feat = global_avg_pool(x)             # (B, 2048) f32
    nc = params['fc_b'].shape[0]
    logits = _matmul_bn_act(feat, params['fc_w'],
                            jnp.ones((nc,), jnp.float32), params['fc_b'],
                            relu=False, out_dtype=jnp.float32)
    return logits


if __name__ == "__main__":
    key = jax.random.PRNGKey(0)
    pkey, xkey = jax.random.split(key)
    params = make_params(pkey, num_classes=3)
    x = jax.random.normal(xkey, (2, 3, 32, 32), jnp.float32)   # small NCHW input
    logits = nonlocal_resnet152_forward(params, x)
    jax.block_until_ready(logits)
    assert logits.shape == (2, 3)
    assert bool(jnp.all(jnp.isfinite(logits)))
    print("KERNEL_OK")
</pallas_src>

<mosaic_0001>
module attributes {stable_mosaic.version = 11 : i64} {
  func.func @kernel(%arg0: i32, %arg1: i32, %arg2: i32, %arg3: memref<512x256xbf16, #tpu.memory_space<vmem>>, %arg4: memref<256x128xbf16, #tpu.memory_space<vmem>>, %arg5: memref<1x128xf32, #tpu.memory_space<vmem>>, %arg6: memref<1x128xf32, #tpu.memory_space<vmem>>, %arg7: memref<512x128xbf16, #tpu.memory_space<vmem>>, %arg8: memref<512x128xf32, #tpu.memory_space<vmem>>) attributes {dimension_semantics = [#tpu.dimension_semantics<parallel>, #tpu.dimension_semantics<parallel>, #tpu.dimension_semantics<arbitrary>], iteration_bounds = array<i64: 1, 1, 1>, scalar_prefetch = 0 : i64, scratch_operands = 1 : i64, tpu.core_type = #tpu.core_type<tc>, window_params = [{transform_indices = @transform_0, window_bounds = array<i64: 512, 256>}, {transform_indices = @transform_1, window_bounds = array<i64: 256, 128>}, {transform_indices = @transform_2, window_bounds = array<i64: 1, 128>}, {transform_indices = @transform_3, window_bounds = array<i64: 1, 128>}, {transform_indices = @transform_4, window_bounds = array<i64: 512, 128>}]} {
    %c0_i32 = arith.constant 0 : i32
    %0 = arith.cmpi eq, %arg2, %c0_i32 : i32
    %1 = arith.extui %0 : i1 to i32
    %c0_i32_0 = arith.constant 0 : i32
    %2 = arith.cmpi ne, %1, %c0_i32_0 : i32
    scf.if %2 {
      %cst_10 = arith.constant 0.000000e+00 : f32
      %12 = vector.broadcast %cst_10 : f32 to vector<512x128xf32>
      %c0_11 = arith.constant 0 : index
      %c0_12 = arith.constant 0 : index
      %13 = vector.load %arg8[%c0_11, %c0_12] : memref<512x128xf32, #tpu.memory_space<vmem>>, vector<512x128xf32>
      tpu.vector_store %arg8[%c0_11, %c0_12], %12 {strides = array<i32>} : memref<512x128xf32, #tpu.memory_space<vmem>>, vector<512x128xf32>,
    } else {
    }
    %c0 = arith.constant 0 : index
    %c0_1 = arith.constant 0 : index
    %3 = vector.load %arg8[%c0, %c0_1] : memref<512x128xf32, #tpu.memory_space<vmem>>, vector<512x128xf32>
    %c0_2 = arith.constant 0 : index
    %c0_3 = arith.constant 0 : index
    %4 = vector.load %arg3[%c0_2, %c0_3] : memref<512x256xbf16, #tpu.memory_space<vmem>>, vector<512x256xbf16>
    %c0_4 = arith.constant 0 : index
    %c0_5 = arith.constant 0 : index
    %5 = vector.load %arg4[%c0_4, %c0_5] : memref<256x128xbf16, #tpu.memory_space<vmem>>, vector<256x128xbf16>
    %cst = arith.constant dense<0.000000e+00> : vector<512x128xf32>
    %6 = tpu.matmul %4, %5, %cst {dimension_numbers = #tpu.dot_dimension_numbers<[1], [0], [0], [1], [0, 0, 1, 1], [], []>} : vector<512x256xbf16>, vector<256x128xbf16>, vector<512x128xf32> -> vector<512x128xf32>
    %7 = arith.addf %3, %6 : vector<512x128xf32>
    %c0_6 = arith.constant 0 : index
    %c0_7 = arith.constant 0 : index
    %8 = vector.load %arg8[%c0_6, %c0_7] : memref<512x128xf32, #tpu.memory_space<vmem>>, vector<512x128xf32>
    tpu.vector_store %arg8[%c0_6, %c0_7], %7 {strides = array<i32>} : memref<512x128xf32, #tpu.memory_space<vmem>>, vector<512x128xf32>,
    %c0_i32_8 = arith.constant 0 : i32
    %9 = arith.cmpi eq, %arg2, %c0_i32_8 : i32
    %10 = arith.extui %9 : i1 to i32
    %c0_i32_9 = arith.constant 0 : i32
    %11 = arith.cmpi ne, %10, %c0_i32_9 : i32
    scf.if %11 {
      %c0_10 = arith.constant 0 : index
      %c0_11 = arith.constant 0 : index
      %12 = vector.load %arg8[%c0_10, %c0_11] : memref<512x128xf32, #tpu.memory_space<vmem>>, vector<512x128xf32>
      %c0_12 = arith.constant 0 : index
      %c0_13 = arith.constant 0 : index
      %13 = vector.load %arg5[%c0_12, %c0_13] : memref<1x128xf32, #tpu.memory_space<vmem>>, vector<1x128xf32>
      %14 = vector.broadcast %13 : vector<1x128xf32> to vector<512x128xf32>
      %15 = arith.mulf %12, %14 : vector<512x128xf32>
      %c0_14 = arith.constant 0 : index
      %c0_15 = arith.constant 0 : index
      %16 = vector.load %arg6[%c0_14, %c0_15] : memref<1x128xf32, #tpu.memory_space<vmem>>, vector<1x128xf32>
      %17 = vector.broadcast %16 : vector<1x128xf32> to vector<512x128xf32>
      %18 = arith.addf %15, %17 : vector<512x128xf32>
      %cst_16 = arith.constant 0.000000e+00 : f32
      %19 = vector.broadcast %cst_16 : f32 to vector<512x128xf32>
      %20 = arith.maximumf %18, %19 : vector<512x128xf32>
      %21 = arith.truncf %20 : vector<512x128xf32> to vector<512x128xbf16>
      %c0_17 = arith.constant 0 : index
      %c0_18 = arith.constant 0 : index
      %22 = vector.load %arg7[%c0_17, %c0_18] : memref<512x128xbf16, #tpu.memory_space<vmem>>, vector<512x128xbf16>
      tpu.vector_store %arg7[%c0_17, %c0_18], %21 {strides = array<i32>} : memref<512x128xbf16, #tpu.memory_space<vmem>>, vector<512x128xbf16>,
    } else {
    }
    return
  }
  func.func @transform_0(%arg0: i32, %arg1: i32, %arg2: i32) -> (i32, i32) {
    %c0_i32 = arith.constant 0 : i32
    return %arg0, %arg2 : i32, i32
  }
  func.func @transform_1(%arg0: i32, %arg1: i32, %arg2: i32) -> (i32, i32) {
    %c0_i32 = arith.constant 0 : i32
    return %arg2, %arg1 : i32, i32
  }
  func.func @transform_2(%arg0: i32, %arg1: i32, %arg2: i32) -> (i32, i32) {
    %c0_i32 = arith.constant 0 : i32
    %c0_i32_0 = arith.constant 0 : i32
    return %c0_i32, %arg1 : i32, i32
  }
  func.func @transform_3(%arg0: i32, %arg1: i32, %arg2: i32) -> (i32, i32) {
    %c0_i32 = arith.constant 0 : i32
    %c0_i32_0 = arith.constant 0 : i32
    return %c0_i32, %arg1 : i32, i32
  }
  func.func @transform_4(%arg0: i32, %arg1: i32, %arg2: i32) -> (i32, i32) {
    %c0_i32 = arith.constant 0 : i32
    return %arg0, %arg1 : i32, i32
  }
}

</mosaic_0001>

<bundles_post_ra>
// kernel: conv_bn_act.1
= control target key start
LH: loop header
LB: loop body
LE: loop exit
PB: predicated region body
PF: predicated region fallthrough
CT: control target
= control target key end

     0   :  { %v2262_v1 = vmov 0   ;;  %s2713_s0 = inlined_call_operand.vmem [shape: bf16[512,256], index: 0, kind: input, shape index: {}]   ;;  %s2714_s1 = inlined_call_operand.vmem [shape: bf16[256,128], index: 1, kind: input, shape index: {}]   ;;  %s2715_s2 = inlined_call_operand.vmem [shape: f32[1,128], index: 2, kind: input, shape index: {}]   ;;  %s2716_s3 = inlined_call_operand.vmem [shape: f32[1,128], index: 3, kind: input, shape index: {}]   ;;  %s2717_s4 = inlined_call_operand.hbm [shape: bf16[512,128], index: 4, kind: output, shape index: {}]  }
   0x1   :  { %v2126_v0 = vld [vmem:[%s2714_s1] sm:$0xff]   ;;  %663 = vmatprep.subr.bf16.mxu0 %v2262_v1  ;;  %2090 = vmatprep.subr.bf16.mxu1 %v2262_v1  ;;  %v2127_v2 = vld [vmem:[%s2714_s1 + $0x8] sm:$0xff]   ;;  %v2128_v3 = vld [vmem:[%s2714_s1 + $0x10] sm:$0xff]  }
   0x2   :  { %664 = vmatpush1.bf16.msra.mxu0 %v2126_v0  ;;  %2106 = vmatpush1.bf16.msra.mxu1 %v2126_v0  ;;  %v2129_v4 = vld [vmem:[%s2714_s1 + $0x18] sm:$0xff]   ;;  %v2130_v5 = vld [vmem:[%s2714_s1 + $0x20] sm:$0xff]   ;;  %v2131_v7 = vld [vmem:[%s2714_s1 + $0x28] sm:$0xff]  }
   0x3   :  { %665 = vmatprep.subr.bf16.mxu0 %v2262_v1  ;;  %2091 = vmatprep.subr.bf16.mxu1 %v2262_v1  ;;  %v2144_v6 = vld [vmem:[%s2713_s0 + $0x4] ss:$8 sps:$4 sm:$0xff]   ;;  %v2132_v9 = vld [vmem:[%s2714_s1 + $0x30] sm:$0xff]   ;;  %v2133_v10 = vld [vmem:[%s2714_s1 + $0x38] sm:$0xff]  }
   0x4   :  { %v2147_v8 = vld [vmem:[%s2713_s0 + $0x104] ss:$8 sps:$4 sm:$0xff]   ;;  %695 = vmatprep.mubr.bf16.mxu0 %v2144_v6  ;;  %v2136_v13 = vld [vmem:[%s2714_s1 + $0x50] sm:$0xff]   ;;  %v2137_v14 = vld [vmem:[%s2714_s1 + $0x58] sm:$0xff]  }
   0x5   :  { %823 = vmatprep.mubr.bf16.mxu1 %v2147_v8  ;;  %v2134_v11 = vld [vmem:[%s2714_s1 + $0x40] sm:$0xff]   ;;  %v2135_v12 = vld [vmem:[%s2714_s1 + $0x48] sm:$0xff]   ;;  %v2140_v17 = vld [vmem:[%s2714_s1 + $0x70] sm:$0xff]  }
   0x6   :  { %666 = vmatpush1.bf16.msra.mxu0 %v2127_v2  ;;  %2107 = vmatpush1.bf16.msra.mxu1 %v2127_v2  ;;  %v2138_v15 = vld [vmem:[%s2714_s1 + $0x60] sm:$0xff]   ;;  %v2139_v16 = vld [vmem:[%s2714_s1 + $0x68] sm:$0xff]   ;;  %v2141_v18 = vld [vmem:[%s2714_s1 + $0x78] sm:$0xff]  }
   0x7   :  { %667 = vmatprep.subr.bf16.mxu0 %v2262_v1  ;;  %2092 = vmatprep.subr.bf16.mxu1 %v2262_v1 }
   0xa   :  { %668 = vmatpush1.bf16.msra.mxu0 %v2128_v3  ;;  %2108 = vmatpush1.bf16.msra.mxu1 %v2128_v3 }
   0xb   :  { %669 = vmatprep.subr.bf16.mxu0 %v2262_v1  ;;  %2093 = vmatprep.subr.bf16.mxu1 %v2262_v1 }
   0xe   :  { %670 = vmatpush1.bf16.msra.mxu0 %v2129_v4  ;;  %2109 = vmatpush1.bf16.msra.mxu1 %v2129_v4 }
   0xf   :  { %671 = vmatprep.subr.bf16.mxu0 %v2262_v1  ;;  %2094 = vmatprep.subr.bf16.mxu1 %v2262_v1 }
  0x12   :  { %672 = vmatpush1.bf16.msra.mxu0 %v2130_v5  ;;  %2110 = vmatpush1.bf16.msra.mxu1 %v2130_v5 }
  0x13   :  { %673 = vmatprep.subr.bf16.mxu0 %v2262_v1  ;;  %2095 = vmatprep.subr.bf16.mxu1 %v2262_v1 }
  0x16   :  { %674 = vmatpush1.bf16.msra.mxu0 %v2131_v7  ;;  %2111 = vmatpush1.bf16.msra.mxu1 %v2131_v7 }
  0x17   :  { %675 = vmatprep.subr.bf16.mxu0 %v2262_v1  ;;  %2096 = vmatprep.subr.bf16.mxu1 %v2262_v1 }
  0x1a   :  { %676 = vmatpush1.bf16.msra.mxu0 %v2132_v9  ;;  %2112 = vmatpush1.bf16.msra.mxu1 %v2132_v9 }
  0x1b   :  { %677 = vmatprep.subr.bf16.mxu0 %v2262_v1  ;;  %2097 = vmatprep.subr.bf16.mxu1 %v2262_v1 }
  0x1e   :  { %678 = vmatpush1.bf16.msra.mxu0 %v2133_v10  ;;  %2113 = vmatpush1.bf16.msra.mxu1 %v2133_v10 }
  0x1f   :  { %679 = vmatprep.subr.bf16.mxu0 %v2262_v1  ;;  %2098 = vmatprep.subr.bf16.mxu1 %v2262_v1 }
  0x22   :  { %680 = vmatpush1.bf16.msra.mxu0 %v2134_v11  ;;  %2114 = vmatpush1.bf16.msra.mxu1 %v2134_v11 }
  0x23   :  { %681 = vmatprep.subr.bf16.mxu0 %v2262_v1  ;;  %2099 = vmatprep.subr.bf16.mxu1 %v2262_v1 }
  0x26   :  { %682 = vmatpush1.bf16.msra.mxu0 %v2135_v12  ;;  %2115 = vmatpush1.bf16.msra.mxu1 %v2135_v12 }
  0x27   :  { %683 = vmatprep.subr.bf16.mxu0 %v2262_v1  ;;  %2100 = vmatprep.subr.bf16.mxu1 %v2262_v1 }
  0x2a   :  { %684 = vmatpush1.bf16.msra.mxu0 %v2136_v13  ;;  %2116 = vmatpush1.bf16.msra.mxu1 %v2136_v13 }
  0x2b   :  { %685 = vmatprep.subr.bf16.mxu0 %v2262_v1  ;;  %2101 = vmatprep.subr.bf16.mxu1 %v2262_v1 }
  0x2e   :  { %686 = vmatpush1.bf16.msra.mxu0 %v2137_v14  ;;  %2117 = vmatpush1.bf16.msra.mxu1 %v2137_v14 }
  0x2f   :  { %687 = vmatprep.subr.bf16.mxu0 %v2262_v1  ;;  %2102 = vmatprep.subr.bf16.mxu1 %v2262_v1 }
  0x32   :  { %688 = vmatpush1.bf16.msra.mxu0 %v2138_v15  ;;  %2118 = vmatpush1.bf16.msra.mxu1 %v2138_v15 }
  0x33   :  { %689 = vmatprep.subr.bf16.mxu0 %v2262_v1  ;;  %2103 = vmatprep.subr.bf16.mxu1 %v2262_v1 }
  0x36   :  { %690 = vmatpush1.bf16.msra.mxu0 %v2139_v16  ;;  %2119 = vmatpush1.bf16.msra.mxu1 %v2139_v16 }
  0x37   :  { %691 = vmatprep.subr.bf16.mxu0 %v2262_v1  ;;  %2104 = vmatprep.subr.bf16.mxu1 %v2262_v1 }
  0x3a   :  { %692 = vmatpush1.bf16.msra.mxu0 %v2140_v17  ;;  %2120 = vmatpush1.bf16.msra.mxu1 %v2140_v17 }
  0x3b   :  { %9 = vsyncpa [#allocation4], 0  ;;  %693 = vmatprep.subr.bf16.mxu0 %v2262_v1  ;;  %2105 = vmatprep.subr.bf16.mxu1 %v2262_v1  ;;  %v2142_v19 = vld [vmem:[%s2713_s0] ss:$8 sps:$4 sm:$0xff]   ;;  %v2148_v21 = vld [vmem:[%s2713_s0 + $0x14] ss:$8 sps:$4 sm:$0xff]  }
  0x3c   :  { %v2145_v20 = vld [vmem:[%s2713_s0 + $0x100] ss:$8 sps:$4 sm:$0xff]   ;;  %v2150_v22 = vld [vmem:[%s2713_s0 + $0x114] ss:$8 sps:$4 sm:$0xff]   ;;  %v2152_v23 = vld [vmem:[%s2713_s0 + $0x10] ss:$8 sps:$4 sm:$0xff]  }
  0x3d   :  { %v2153_v24 = vld [vmem:[%s2713_s0 + $0x110] ss:$8 sps:$4 sm:$0xff]   ;;  %v2154_v25 = vld [vmem:[%s2713_s0 + $0x24] ss:$8 sps:$4 sm:$0xff]   ;;  %v2158_v27 = vld [vmem:[%s2713_s0 + $0x20] ss:$8 sps:$4 sm:$0xff]  }
  0x3e   :  { %694 = vmatpush1.bf16.msra.mxu0 %v2141_v18  ;;  %2121 = vmatpush1.bf16.msra.mxu1 %v2141_v18  ;;  %v2156_v26 = vld [vmem:[%s2713_s0 + $0x124] ss:$8 sps:$4 sm:$0xff]   ;;  %v2159_v28 = vld [vmem:[%s2713_s0 + $0x120] ss:$8 sps:$4 sm:$0xff]   ;;  %v2160_v29 = vld [vmem:[%s2713_s0 + $0x34] ss:$8 sps:$4 sm:$0xff]  }
  0x3f   :  { %v2162_v30 = vld [vmem:[%s2713_s0 + $0x134] ss:$8 sps:$4 sm:$0xff]   ;;  %v2164_v31 = vld [vmem:[%s2713_s0 + $0x30] ss:$8 sps:$4 sm:$0xff]   ;;  %v2166_v33 = vld [vmem:[%s2713_s0 + $0x44] ss:$8 sps:$4 sm:$0xff]  }
  0x40   :  { %v2165_v32 = vld [vmem:[%s2713_s0 + $0x130] ss:$8 sps:$4 sm:$0xff]   ;;  %v2168_v34 = vld [vmem:[%s2713_s0 + $0x144] ss:$8 sps:$4 sm:$0xff]   ;;  %v2170_v35 = vld [vmem:[%s2713_s0 + $0x40] ss:$8 sps:$4 sm:$0xff]  }
  0x41   :  { %696 = vmatmul.mubr.bf16.vlgmr.msra.gmra.mrb[0].mxu0 %v2142_v19  ;;  %824 = vmatmul.mubr.bf16.vlgmr.msra.gmra.mrb[0].mxu1 %v2145_v20  ;;  %v2171_v36 = vld [vmem:[%s2713_s0 + $0x140] ss:$8 sps:$4 sm:$0xff]   ;;  %v2172_v37 = vld [vmem:[%s2713_s0 + $0x54] ss:$8 sps:$4 sm:$0xff]   ;;  %v2176_v39 = vld [vmem:[%s2713_s0 + $0x50] ss:$8 sps:$4 sm:$0xff]  }
  0x42   :  { %703 = vmatprep.mubr.bf16.mxu0 %v2148_v21  ;;  %831 = vmatprep.mubr.bf16.mxu1 %v2150_v22  ;;  %v2174_v38 = vld [vmem:[%s2713_s0 + $0x154] ss:$8 sps:$4 sm:$0xff]   ;;  %v2177_v40 = vld [vmem:[%s2713_s0 + $0x150] ss:$8 sps:$4 sm:$0xff]   ;;  %v2178_v41 = vld [vmem:[%s2713_s0 + $0x64] ss:$8 sps:$4 sm:$0xff]  }
  0x43   :  { %v2180_v42 = vld [vmem:[%s2713_s0 + $0x164] ss:$8 sps:$4 sm:$0xff]   ;;  %v2182_v43 = vld [vmem:[%s2713_s0 + $0x60] ss:$8 sps:$4 sm:$0xff]   ;;  %v2184_v45 = vld [vmem:[%s2713_s0 + $0x74] ss:$8 sps:$4 sm:$0xff]  }
  0x44   :  { %v2183_v44 = vld [vmem:[%s2713_s0 + $0x160] ss:$8 sps:$4 sm:$0xff]   ;;  %v2186_v46 = vld [vmem:[%s2713_s0 + $0x174] ss:$8 sps:$4 sm:$0xff]   ;;  %v2188_v47 = vld [vmem:[%s2713_s0 + $0x70] ss:$8 sps:$4 sm:$0xff]  }
  0x45   :  { %v2189_v48 = vld [vmem:[%s2713_s0 + $0x170] ss:$8 sps:$4 sm:$0xff]   ;;  %v2190_v49 = vld [vmem:[%s2713_s0 + $0x84] ss:$8 sps:$4 sm:$0xff]   ;;  %v2194_v51 = vld [vmem:[%s2713_s0 + $0x80] ss:$8 sps:$4 sm:$0xff]  }
  0x46   :  { %v2192_v50 = vld [vmem:[%s2713_s0 + $0x184] ss:$8 sps:$4 sm:$0xff]   ;;  %v2195_v52 = vld [vmem:[%s2713_s0 + $0x180] ss:$8 sps:$4 sm:$0xff]   ;;  %v2196_v53 = vld [vmem:[%s2713_s0 + $0x94] ss:$8 sps:$4 sm:$0xff]  }
  0x47   :  { %v2198_v54 = vld [vmem:[%s2713_s0 + $0x194] ss:$8 sps:$4 sm:$0xff]   ;;  %v2200_v55 = vld [vmem:[%s2713_s0 + $0x90] ss:$8 sps:$4 sm:$0xff]   ;;  %v2202_v57 = vld [vmem:[%s2713_s0 + $0xa4] ss:$8 sps:$4 sm:$0xff]  }
  0x48   :  { %v2201_v56 = vld [vmem:[%s2713_s0 + $0x190] ss:$8 sps:$4 sm:$0xff]   ;;  %v2204_v58 = vld [vmem:[%s2713_s0 + $0x1a4] ss:$8 sps:$4 sm:$0xff]   ;;  %v2206_v59 = vld [vmem:[%s2713_s0 + $0xa0] ss:$8 sps:$4 sm:$0xff]  }
  0x49   :  { %704 = vmatmul.mubr.bf16.gmra.mrb[4].mxu0 %v2152_v23  ;;  %832 = vmatmul.mubr.bf16.gmra.mrb[4].mxu1 %v2153_v24  ;;  %v2207_v60 = vld [vmem:[%s2713_s0 + $0x1a0] ss:$8 sps:$4 sm:$0xff]   ;;  %v2208_v61 = vld [vmem:[%s2713_s0 + $0xb4] ss:$8 sps:$4 sm:$0xff]   ;;  %v2212_v63 = vld [vmem:[%s2713_s0 + $0xb0] ss:$8 sps:$4 sm:$0xff]  }
  0x4a   :  { %711 = vmatprep.mubr.bf16.mxu0 %v2154_v25  ;;  %839 = vmatprep.mubr.bf16.mxu1 %v2156_v26  ;;  %v2210_v62 = vld [vmem:[%s2713_s0 + $0x1b4] ss:$8 sps:$4 sm:$0xff]   ;;  %v2213_v0 = vld [vmem:[%s2713_s0 + $0x1b0] ss:$8 sps:$4 sm:$0xff]   ;;  %v2214_v1 = vld [vmem:[%s2713_s0 + $0xc4] ss:$8 sps:$4 sm:$0xff]  }
  0x4b   :  { %v2216_v2 = vld [vmem:[%s2713_s0 + $0x1c4] ss:$8 sps:$4 sm:$0xff]   ;;  %v2218_v3 = vld [vmem:[%s2713_s0 + $0xc0] ss:$8 sps:$4 sm:$0xff]   ;;  %v2220_v5 = vld [vmem:[%s2713_s0 + $0xd4] ss:$8 sps:$4 sm:$0xff]  }
  0x4c   :  { %v2219_v4 = vld [vmem:[%s2713_s0 + $0x1c0] ss:$8 sps:$4 sm:$0xff]   ;;  %v2222_v6 = vld [vmem:[%s2713_s0 + $0x1d4] ss:$8 sps:$4 sm:$0xff]   ;;  %v2224_v7 = vld [vmem:[%s2713_s0 + $0xd0] ss:$8 sps:$4 sm:$0xff]  }
  0x4d   :  { %v2225_v8 = vld [vmem:[%s2713_s0 + $0x1d0] ss:$8 sps:$4 sm:$0xff]   ;;  %v2226_v9 = vld [vmem:[%s2713_s0 + $0xe4] ss:$8 sps:$4 sm:$0xff]   ;;  %v2230_v11 = vld [vmem:[%s2713_s0 + $0xe0] ss:$8 sps:$4 sm:$0xff]  }
  0x4e   :  { %v2228_v10 = vld [vmem:[%s2713_s0 + $0x1e4] ss:$8 sps:$4 sm:$0xff]   ;;  %v2231_v12 = vld [vmem:[%s2713_s0 + $0x1e0] ss:$8 sps:$4 sm:$0xff]   ;;  %v2232_v13 = vld [vmem:[%s2713_s0 + $0xf4] ss:$8 sps:$4 sm:$0xff]  }
  0x4f   :  { %v2234_v14 = vld [vmem:[%s2713_s0 + $0x1f4] ss:$8 sps:$4 sm:$0xff]   ;;  %v2236_v15 = vld [vmem:[%s2713_s0 + $0xf0] ss:$8 sps:$4 sm:$0xff]   ;;  %v2566_v17 = vld [vmem:[%s2715_s2] ss:$0 sm:$0xff] }
  0x50   :  { %v2237_v16 = vld [vmem:[%s2713_s0 + $0x1f0] ss:$8 sps:$4 sm:$0xff]   ;;  %v2571_v19 = vld [vmem:[%s2716_s3] ss:$0 sm:$0xff]  ;;  %s2263_s0 = smov [#allocation3]  }
  0x51   :  { %712 = vmatmul.mubr.bf16.gmra.mrb[8].mxu0 %v2158_v27  ;;  %840 = vmatmul.mubr.bf16.gmra.mrb[8].mxu1 %v2159_v28  ;;  %s1678_s2 = sshll.u32 %s2263_s0, 4  ;;  %s1679_s2 = int_to_ptr.vmem [resolvable:$true] %s1678_s2 }
  0x52   :  { %719 = vmatprep.mubr.bf16.mxu0 %v2160_v29  ;;  %847 = vmatprep.mubr.bf16.mxu1 %v2162_v30  ;;  %s2238_s3 = scalar_lea.vmem %s1679_s2, 4096  ;;  %p2243_p1 = scmp.lt.s32.totalorder %s1679_s2, %s1679_s2 }
  0x53   :  { %p2239_p0 = scmp.ne.s32.totalorder %s1679_s2, %s2238_s3  ;;  %p2244_p2 = scmp.lt.s32.totalorder %s2238_s3, %s2238_s3 }
  0x55   :  { %p2245_p3 = por %p2244_p2, %p2243_p1 }
  0x57   :  { %p2246_p4 = pnand %p2245_p3, %p2239_p0 }
  0x59   :  { %720 = vmatmul.mubr.bf16.gmra.mrb[12].mxu0 %v2164_v31  ;;  %848 = vmatmul.mubr.bf16.gmra.mrb[12].mxu1 %v2165_v32 }
  0x5a   :  { %727 = vmatprep.mubr.bf16.mxu0 %v2166_v33  ;;  %855 = vmatprep.mubr.bf16.mxu1 %v2168_v34 }
  0x61   :  { %728 = vmatmul.mubr.bf16.gmra.mrb[16].mxu0 %v2170_v35  ;;  %856 = vmatmul.mubr.bf16.gmra.mrb[16].mxu1 %v2171_v36 }
  0x62   :  { %735 = vmatprep.mubr.bf16.mxu0 %v2172_v37  ;;  %863 = vmatprep.mubr.bf16.mxu1 %v2174_v38 }
  0x69   :  { %736 = vmatmul.mubr.bf16.gmra.mrb[20].mxu0 %v2176_v39  ;;  %864 = vmatmul.mubr.bf16.gmra.mrb[20].mxu1 %v2177_v40 }
  0x6a   :  { %743 = vmatprep.mubr.bf16.mxu0 %v2178_v41  ;;  %871 = vmatprep.mubr.bf16.mxu1 %v2180_v42 }
  0x71   :  { %744 = vmatmul.mubr.bf16.gmra.mrb[24].mxu0 %v2182_v43  ;;  %872 = vmatmul.mubr.bf16.gmra.mrb[24].mxu1 %v2183_v44 }
  0x72   :  { %751 = vmatprep.mubr.bf16.mxu0 %v2184_v45  ;;  %879 = vmatprep.mubr.bf16.mxu1 %v2186_v46 }
  0x79   :  { %752 = vmatmul.mubr.bf16.gmra.mrb[28].mxu0 %v2188_v47  ;;  %880 = vmatmul.mubr.bf16.gmra.mrb[28].mxu1 %v2189_v48 }
  0x7a   :  { %759 = vmatprep.mubr.bf16.mxu0 %v2190_v49  ;;  %887 = vmatprep.mubr.bf16.mxu1 %v2192_v50 }
  0x81   :  { %760 = vmatmul.mubr.bf16.gmra.mrb[32].mxu0 %v2194_v51  ;;  %888 = vmatmul.mubr.bf16.gmra.mrb[32].mxu1 %v2195_v52 }
  0x82   :  { %767 = vmatprep.mubr.bf16.mxu0 %v2196_v53  ;;  %895 = vmatprep.mubr.bf16.mxu1 %v2198_v54 }
  0x89   :  { %768 = vmatmul.mubr.bf16.gmra.mrb[36].mxu0 %v2200_v55  ;;  %896 = vmatmul.mubr.bf16.gmra.mrb[36].mxu1 %v2201_v56 }
  0x8a   :  { %775 = vmatprep.mubr.bf16.mxu0 %v2202_v57  ;;  %903 = vmatprep.mubr.bf16.mxu1 %v2204_v58 }
  0x91   :  { %776 = vmatmul.mubr.bf16.gmra.mrb[40].mxu0 %v2206_v59  ;;  %904 = vmatmul.mubr.bf16.gmra.mrb[40].mxu1 %v2207_v60 }
  0x92   :  { %783 = vmatprep.mubr.bf16.mxu0 %v2208_v61  ;;  %911 = vmatprep.mubr.bf16.mxu1 %v2210_v62 }
  0x99   :  { %784 = vmatmul.mubr.bf16.gmra.mrb[44].mxu0 %v2212_v63  ;;  %912 = vmatmul.mubr.bf16.gmra.mrb[44].mxu1 %v2213_v0 }
  0x9a   :  { %791 = vmatprep.mubr.bf16.mxu0 %v2214_v1  ;;  %919 = vmatprep.mubr.bf16.mxu1 %v2216_v2 }
  0xa1   :  { %792 = vmatmul.mubr.bf16.gmra.mrb[48].mxu0 %v2218_v3  ;;  %920 = vmatmul.mubr.bf16.gmra.mrb[48].mxu1 %v2219_v4 }
  0xa2   :  { %799 = vmatprep.mubr.bf16.mxu0 %v2220_v5  ;;  %927 = vmatprep.mubr.bf16.mxu1 %v2222_v6 }
  0xa9   :  { %800 = vmatmul.mubr.bf16.gmra.mrb[52].mxu0 %v2224_v7  ;;  %928 = vmatmul.mubr.bf16.gmra.mrb[52].mxu1 %v2225_v8 }
  0xaa   :  { %807 = vmatprep.mubr.bf16.mxu0 %v2226_v9  ;;  %935 = vmatprep.mubr.bf16.mxu1 %v2228_v10 }
  0xb1   :  { %808 = vmatmul.mubr.bf16.gmra.mrb[56].mxu0 %v2230_v11  ;;  %936 = vmatmul.mubr.bf16.gmra.mrb[56].mxu1 %v2231_v12 }
  0xb2   :  { %815 = vmatprep.mubr.bf16.mxu0 %v2232_v13  ;;  %943 = vmatprep.mubr.bf16.mxu1 %v2234_v14 }
  0xb9   :  { %816 = vmatmul.mubr.bf16.gmra.mrb[60].mxu0 %v2236_v15  ;;  %944 = vmatmul.mubr.bf16.gmra.mrb[60].mxu1 %v2237_v16 }
 0x114   :  { %v697_v18 = vpop.f32.mrb[0].mxu0  ;;  %v825_v20 = vpop.f32.mrb[0].mxu1 }
 0x115   :  { %v1154_v21 = vmul.f32 %v2566_v17, %v697_v18  ;;  %v1186_v22 = vmul.f32 %v2566_v17, %v825_v20  ;;  %v699_v23 = vpop.f32.mrb[1].mxu0  ;;  %v827_v24 = vpop.f32.mrb[1].mxu1 }
 0x116   :  { %v700_v25 = vpop.f32.mrb[2].mxu0  ;;  %v828_v26 = vpop.f32.mrb[2].mxu1 }
 0x117   :  { %v1225_v27 = vadd.f32 %v2571_v19, %v1154_v21  ;;  %v1257_v28 = vadd.f32 %v2571_v19, %v1186_v22  ;;  %v1155_v29 = vmul.f32 %v2566_v17, %v700_v25  ;;  %v1187_v30 = vmul.f32 %v2566_v17, %v828_v26  ;;  %v702_v31 = vpop.f32.mrb[3].mxu0  ;;  %v830_v32 = vpop.f32.mrb[3].mxu1 }
 0x119   :  { %v1226_v33 = vadd.f32 %v2571_v19, %v1155_v29  ;;  %v1258_v34 = vadd.f32 %v2571_v19, %v1187_v30  ;;  %v1289_v35 = vmax.f32 %v1225_v27, 0.0  ;;  %v1321_v36 = vmax.f32 %v1257_v28, 0.0 }
 0x11b   :  { %v1290_v37 = vmax.f32 %v1226_v33, 0.0  ;;  %v1322_v38 = vmax.f32 %v1258_v34, 0.0 }
 0x11c   :  { %v705_v39 = vpop.f32.mrb[4].mxu0  ;;  %v833_v40 = vpop.f32.mrb[4].mxu1 }
 0x11d   :  { %v1902_v41 = vpack.c.bf16 %v1290_v37, %v1289_v35  ;;  %v1982_v42 = vpack.c.bf16 %v1322_v38, %v1321_v36  ;;  %v1156_v43 = vmul.f32 %v2566_v17, %v705_v39  ;;  %v1188_v44 = vmul.f32 %v2566_v17, %v833_v40  ;;  %v707_v45 = vpop.f32.mrb[5].mxu0  ;;  %v835_v46 = vpop.f32.mrb[5].mxu1 }
 0x11e   :  { %v708_v47 = vpop.f32.mrb[6].mxu0  ;;  %v836_v48 = vpop.f32.mrb[6].mxu1 }
 0x11f   :  { %1903 = vst [vmem:[#allocation3] sm:$0xff] %v1902_v41   ;;  %2074 = vst [vmem:[#allocation3 + $0x80] sm:$0xff] %v1982_v42   ;;  %v1227_v49 = vadd.f32 %v2571_v19, %v1156_v43  ;;  %v1259_v50 = vadd.f32 %v2571_v19, %v1188_v44  ;;  %v1157_v51 = vmul.f32 %v2566_v17, %v708_v47  ;;  %v710_v53 = vpop.f32.mrb[7].mxu0  ;;  %v838_v54 = vpop.f32.mrb[7].mxu1 }
 0x120   :  { %v1189_v52 = vmul.f32 %v2566_v17, %v836_v48 }
 0x121   :  { %v1228_v55 = vadd.f32 %v2571_v19, %v1157_v51  ;;  %v1291_v57 = vmax.f32 %v1227_v49, 0.0  ;;  %v1323_v58 = vmax.f32 %v1259_v50, 0.0 }
 0x122   :  { %v1260_v56 = vadd.f32 %v2571_v19, %v1189_v52 }
 0x123   :  { %v1292_v59 = vmax.f32 %v1228_v55, 0.0 }
 0x124   :  { %v1324_v60 = vmax.f32 %v1260_v56, 0.0  ;;  %v713_v61 = vpop.f32.mrb[8].mxu0  ;;  %v841_v62 = vpop.f32.mrb[8].mxu1 }
 0x125   :  { %v1907_v63 = vpack.c.bf16 %v1292_v59, %v1291_v57  ;;  %v1158_v1 = vmul.f32 %v2566_v17, %v713_v61  ;;  %v1190_v2 = vmul.f32 %v2566_v17, %v841_v62  ;;  %v715_v3 = vpop.f32.mrb[9].mxu0  ;;  %v843_v4 = vpop.f32.mrb[9].mxu1 }
 0x126   :  { %v1987_v0 = vpack.c.bf16 %v1324_v60, %v1323_v58  ;;  %v716_v5 = vpop.f32.mrb[10].mxu0  ;;  %v844_v6 = vpop.f32.mrb[10].mxu1 }
 0x127   :  { %2059 = vst [vmem:[#allocation3 + $0x8] sm:$0xff] %v1907_v63   ;;  %v1229_v7 = vadd.f32 %v2571_v19, %v1158_v1  ;;  %v1261_v8 = vadd.f32 %v2571_v19, %v1190_v2  ;;  %v1159_v9 = vmul.f32 %v2566_v17, %v716_v5  ;;  %v1191_v10 = vmul.f32 %v2566_v17, %v844_v6  ;;  %v718_v11 = vpop.f32.mrb[11].mxu0  ;;  %v846_v12 = vpop.f32.mrb[11].mxu1 }
 0x128   :  { %2075 = vst [vmem:[#allocation3 + $0x88] sm:$0xff] %v1987_v0  }
 0x129   :  { %v1230_v13 = vadd.f32 %v2571_v19, %v1159_v9  ;;  %v1262_v14 = vadd.f32 %v2571_v19, %v1191_v10  ;;  %v1293_v15 = vmax.f32 %v1229_v7, 0.0  ;;  %v1325_v16 = vmax.f32 %v1261_v8, 0.0 }
 0x12b   :  { %v1294_v18 = vmax.f32 %v1230_v13, 0.0  ;;  %v1326_v20 = vmax.f32 %v1262_v14, 0.0 }
 0x12c   :  { %v721_v21 = vpop.f32.mrb[12].mxu0  ;;  %v849_v22 = vpop.f32.mrb[12].mxu1 }
 0x12d   :  { %v1912_v23 = vpack.c.bf16 %v1294_v18, %v1293_v15  ;;  %v1992_v24 = vpack.c.bf16 %v1326_v20, %v1325_v16  ;;  %v1160_v25 = vmul.f32 %v2566_v17, %v721_v21  ;;  %v1192_v26 = vmul.f32 %v2566_v17, %v849_v22  ;;  %v723_v27 = vpop.f32.mrb[13].mxu0  ;;  %v851_v28 = vpop.f32.mrb[13].mxu1 }
 0x12e   :  { %v724_v29 = vpop.f32.mrb[14].mxu0  ;;  %v852_v30 = vpop.f32.mrb[14].mxu1 }
 0x12f   :  { %2060 = vst [vmem:[#allocation3 + $0x10] sm:$0xff] %v1912_v23   ;;  %2076 = vst [vmem:[#allocation3 + $0x90] sm:$0xff] %v1992_v24   ;;  %v1231_v31 = vadd.f32 %v2571_v19, %v1160_v25  ;;  %v1263_v32 = vadd.f32 %v2571_v19, %v1192_v26  ;;  %v1161_v33 = vmul.f32 %v2566_v17, %v724_v29  ;;  %v726_v35 = vpop.f32.mrb[15].mxu0  ;;  %v854_v36 = vpop.f32.mrb[15].mxu1 }
 0x130   :  { %v1193_v34 = vmul.f32 %v2566_v17, %v852_v30 }
 0x131   :  { %v1232_v37 = vadd.f32 %v2571_v19, %v1161_v33  ;;  %v1295_v39 = vmax.f32 %v1231_v31, 0.0  ;;  %v1327_v40 = vmax.f32 %v1263_v32, 0.0 }
 0x132   :  { %v1264_v38 = vadd.f32 %v2571_v19, %v1193_v34 }
 0x133   :  { %v1296_v41 = vmax.f32 %v1232_v37, 0.0 }
 0x134   :  { %v1328_v42 = vmax.f32 %v1264_v38, 0.0  ;;  %v729_v43 = vpop.f32.mrb[16].mxu0  ;;  %v857_v44 = vpop.f32.mrb[16].mxu1 }
 0x135   :  { %v1917_v45 = vpack.c.bf16 %v1296_v41, %v1295_v39  ;;  %v1162_v47 = vmul.f32 %v2566_v17, %v729_v43  ;;  %v1194_v48 = vmul.f32 %v2566_v17, %v857_v44  ;;  %v731_v49 = vpop.f32.mrb[17].mxu0  ;;  %v859_v50 = vpop.f32.mrb[17].mxu1 }
 0x136   :  { %v1997_v46 = vpack.c.bf16 %v1328_v42, %v1327_v40  ;;  %v732_v51 = vpop.f32.mrb[18].mxu0  ;;  %v860_v52 = vpop.f32.mrb[18].mxu1 }
 0x137   :  { %2061 = vst [vmem:[#allocation3 + $0x18] sm:$0xff] %v1917_v45   ;;  %v1233_v53 = vadd.f32 %v2571_v19, %v1162_v47  ;;  %v1265_v54 = vadd.f32 %v2571_v19, %v1194_v48  ;;  %v1163_v55 = vmul.f32 %v2566_v17, %v732_v51  ;;  %v1195_v56 = vmul.f32 %v2566_v17, %v860_v52  ;;  %v734_v57 = vpop.f32.mrb[19].mxu0  ;;  %v862_v58 = vpop.f32.mrb[19].mxu1 }
 0x138   :  { %2077 = vst [vmem:[#allocation3 + $0x98] sm:$0xff] %v1997_v46  }
 0x139   :  { %v1234_v59 = vadd.f32 %v2571_v19, %v1163_v55  ;;  %v1266_v60 = vadd.f32 %v2571_v19, %v1195_v56  ;;  %v1297_v61 = vmax.f32 %v1233_v53, 0.0  ;;  %v1329_v62 = vmax.f32 %v1265_v54, 0.0 }
 0x13b   :  { %v1298_v63 = vmax.f32 %v1234_v59, 0.0  ;;  %v1330_v0 = vmax.f32 %v1266_v60, 0.0 }
 0x13c   :  { %v737_v1 = vpop.f32.mrb[20].mxu0  ;;  %v865_v2 = vpop.f32.mrb[20].mxu1 }
 0x13d   :  { %v1922_v3 = vpack.c.bf16 %v1298_v63, %v1297_v61  ;;  %v2002_v4 = vpack.c.bf16 %v1330_v0, %v1329_v62  ;;  %v1164_v5 = vmul.f32 %v2566_v17, %v737_v1  ;;  %v1196_v6 = vmul.f32 %v2566_v17, %v865_v2  ;;  %v739_v7 = vpop.f32.mrb[21].mxu0  ;;  %v867_v8 = vpop.f32.mrb[21].mxu1 }
 0x13e   :  { %v740_v9 = vpop.f32.mrb[22].mxu0  ;;  %v868_v10 = vpop.f32.mrb[22].mxu1 }
 0x13f   :  { %2062 = vst [vmem:[#allocation3 + $0x20] sm:$0xff] %v1922_v3   ;;  %2078 = vst [vmem:[#allocation3 + $0xa0] sm:$0xff] %v2002_v4   ;;  %v1235_v11 = vadd.f32 %v2571_v19, %v1164_v5  ;;  %v1267_v12 = vadd.f32 %v2571_v19, %v1196_v6  ;;  %v1165_v13 = vmul.f32 %v2566_v17, %v740_v9  ;;  %v742_v15 = vpop.f32.mrb[23].mxu0  ;;  %v870_v16 = vpop.f32.mrb[23].mxu1 }
 0x140   :  { %v1197_v14 = vmul.f32 %v2566_v17, %v868_v10 }
 0x141   :  { %v1236_v18 = vadd.f32 %v2571_v19, %v1165_v13  ;;  %v1299_v21 = vmax.f32 %v1235_v11, 0.0  ;;  %v1331_v22 = vmax.f32 %v1267_v12, 0.0 }
 0x142   :  { %v1268_v20 = vadd.f32 %v2571_v19, %v1197_v14 }
 0x143   :  { %v1300_v23 = vmax.f32 %v1236_v18, 0.0 }
 0x144   :  { %v1332_v24 = vmax.f32 %v1268_v20, 0.0  ;;  %v745_v25 = vpop.f32.mrb[24].mxu0  ;;  %v873_v26 = vpop.f32.mrb[24].mxu1 }
 0x145   :  { %v1927_v27 = vpack.c.bf16 %v1300_v23, %v1299_v21  ;;  %v1166_v29 = vmul.f32 %v2566_v17, %v745_v25  ;;  %v1198_v30 = vmul.f32 %v2566_v17, %v873_v26  ;;  %v747_v31 = vpop.f32.mrb[25].mxu0  ;;  %v875_v32 = vpop.f32.mrb[25].mxu1 }
 0x146   :  { %v2007_v28 = vpack.c.bf16 %v1332_v24, %v1331_v22  ;;  %v748_v33 = vpop.f32.mrb[26].mxu0  ;;  %v876_v34 = vpop.f32.mrb[26].mxu1 }
 0x147   :  { %2063 = vst [vmem:[#allocation3 + $0x28] sm:$0xff] %v1927_v27   ;;  %v1237_v35 = vadd.f32 %v2571_v19, %v1166_v29  ;;  %v1269_v36 = vadd.f32 %v2571_v19, %v1198_v30  ;;  %v1167_v37 = vmul.f32 %v2566_v17, %v748_v33  ;;  %v1199_v38 = vmul.f32 %v2566_v17, %v876_v34  ;;  %v750_v39 = vpop.f32.mrb[27].mxu0  ;;  %v878_v40 = vpop.f32.mrb[27].mxu1 }
 0x148   :  { %2079 = vst [vmem:[#allocation3 + $0xa8] sm:$0xff] %v2007_v28  }
 0x149   :  { %v1238_v41 = vadd.f32 %v2571_v19, %v1167_v37  ;;  %v1270_v42 = vadd.f32 %v2571_v19, %v1199_v38  ;;  %v1301_v43 = vmax.f32 %v1237_v35, 0.0  ;;  %v1333_v44 = vmax.f32 %v1269_v36, 0.0 }
 0x14b   :  { %v1302_v45 = vmax.f32 %v1238_v41, 0.0  ;;  %v1334_v46 = vmax.f32 %v1270_v42, 0.0 }
 0x14c   :  { %v753_v47 = vpop.f32.mrb[28].mxu0  ;;  %v881_v48 = vpop.f32.mrb[28].mxu1 }
 0x14d   :  { %v1932_v49 = vpack.c.bf16 %v1302_v45, %v1301_v43  ;;  %v2012_v50 = vpack.c.bf16 %v1334_v46, %v1333_v44  ;;  %v1168_v51 = vmul.f32 %v2566_v17, %v753_v47  ;;  %v1200_v52 = vmul.f32 %v2566_v17, %v881_v48  ;;  %v755_v53 = vpop.f32.mrb[29].mxu0  ;;  %v883_v54 = vpop.f32.mrb[29].mxu1 }
 0x14e   :  { %v756_v55 = vpop.f32.mrb[30].mxu0  ;;  %v884_v56 = vpop.f32.mrb[30].mxu1 }
 0x14f   :  { %2064 = vst [vmem:[#allocation3 + $0x30] sm:$0xff] %v1932_v49   ;;  %2080 = vst [vmem:[#allocation3 + $0xb0] sm:$0xff] %v2012_v50   ;;  %v1239_v57 = vadd.f32 %v2571_v19, %v1168_v51  ;;  %v1271_v58 = vadd.f32 %v2571_v19, %v1200_v52  ;;  %v1169_v59 = vmul.f32 %v2566_v17, %v756_v55  ;;  %v758_v61 = vpop.f32.mrb[31].mxu0  ;;  %v886_v62 = vpop.f32.mrb[31].mxu1 }
 0x150   :  { %v1201_v60 = vmul.f32 %v2566_v17, %v884_v56 }
 0x151   :  { %v1240_v63 = vadd.f32 %v2571_v19, %v1169_v59  ;;  %v1303_v1 = vmax.f32 %v1239_v57, 0.0  ;;  %v1335_v2 = vmax.f32 %v1271_v58, 0.0 }
 0x152   :  { %v1272_v0 = vadd.f32 %v2571_v19, %v1201_v60 }
 0x153   :  { %v1304_v3 = vmax.f32 %v1240_v63, 0.0 }
 0x154   :  { %v1336_v4 = vmax.f32 %v1272_v0, 0.0  ;;  %v761_v5 = vpop.f32.mrb[32].mxu0  ;;  %v889_v6 = vpop.f32.mrb[32].mxu1 }
 0x155   :  { %v1937_v7 = vpack.c.bf16 %v1304_v3, %v1303_v1  ;;  %v1170_v9 = vmul.f32 %v2566_v17, %v761_v5  ;;  %v1202_v10 = vmul.f32 %v2566_v17, %v889_v6  ;;  %v763_v11 = vpop.f32.mrb[33].mxu0  ;;  %v891_v12 = vpop.f32.mrb[33].mxu1 }
 0x156   :  { %v2017_v8 = vpack.c.bf16 %v1336_v4, %v1335_v2  ;;  %v764_v13 = vpop.f32.mrb[34].mxu0  ;;  %v892_v14 = vpop.f32.mrb[34].mxu1 }
 0x157   :  { %2065 = vst [vmem:[#allocation3 + $0x38] sm:$0xff] %v1937_v7   ;;  %v1241_v15 = vadd.f32 %v2571_v19, %v1170_v9  ;;  %v1273_v16 = vadd.f32 %v2571_v19, %v1202_v10  ;;  %v1171_v18 = vmul.f32 %v2566_v17, %v764_v13  ;;  %v1203_v20 = vmul.f32 %v2566_v17, %v892_v14  ;;  %v766_v21 = vpop.f32.mrb[35].mxu0  ;;  %v894_v22 = vpop.f32.mrb[35].mxu1 }
 0x158   :  { %2081 = vst [vmem:[#allocation3 + $0xb8] sm:$0xff] %v2017_v8  }
 0x159   :  { %v1242_v23 = vadd.f32 %v2571_v19, %v1171_v18  ;;  %v1274_v24 = vadd.f32 %v2571_v19, %v1203_v20  ;;  %v1305_v25 = vmax.f32 %v1241_v15, 0.0  ;;  %v1337_v26 = vmax.f32 %v1273_v16, 0.0 }
 0x15b   :  { %v1306_v27 = vmax.f32 %v1242_v23, 0.0  ;;  %v1338_v28 = vmax.f32 %v1274_v24, 0.0 }
 0x15c   :  { %v769_v29 = vpop.f32.mrb[36].mxu0  ;;  %v897_v30 = vpop.f32.mrb[36].mxu1 }
 0x15d   :  { %v1942_v31 = vpack.c.bf16 %v1306_v27, %v1305_v25  ;;  %v2022_v32 = vpack.c.bf16 %v1338_v28, %v1337_v26  ;;  %v1172_v33 = vmul.f32 %v2566_v17, %v769_v29  ;;  %v1204_v34 = vmul.f32 %v2566_v17, %v897_v30  ;;  %v771_v35 = vpop.f32.mrb[37].mxu0  ;;  %v899_v36 = vpop.f32.mrb[37].mxu1 }
 0x15e   :  { %v772_v37 = vpop.f32.mrb[38].mxu0  ;;  %v900_v38 = vpop.f32.mrb[38].mxu1 }
 0x15f   :  { %2066 = vst [vmem:[#allocation3 + $0x40] sm:$0xff] %v1942_v31   ;;  %2082 = vst [vmem:[#allocation3 + $0xc0] sm:$0xff] %v2022_v32   ;;  %v1243_v39 = vadd.f32 %v2571_v19, %v1172_v33  ;;  %v1275_v40 = vadd.f32 %v2571_v19, %v1204_v34  ;;  %v1173_v41 = vmul.f32 %v2566_v17, %v772_v37  ;;  %v774_v43 = vpop.f32.mrb[39].mxu0  ;;  %v902_v44 = vpop.f32.mrb[39].mxu1 }
 0x160   :  { %v1205_v42 = vmul.f32 %v2566_v17, %v900_v38 }
 0x161   :  { %v1244_v45 = vadd.f32 %v2571_v19, %v1173_v41  ;;  %v1307_v47 = vmax.f32 %v1243_v39, 0.0  ;;  %v1339_v48 = vmax.f32 %v1275_v40, 0.0 }
 0x162   :  { %v1276_v46 = vadd.f32 %v2571_v19, %v1205_v42 }
 0x163   :  { %v1308_v49 = vmax.f32 %v1244_v45, 0.0 }
 0x164   :  { %v1340_v50 = vmax.f32 %v1276_v46, 0.0  ;;  %v777_v51 = vpop.f32.mrb[40].mxu0  ;;  %v905_v52 = vpop.f32.mrb[40].mxu1 }
 0x165   :  { %v1947_v53 = vpack.c.bf16 %v1308_v49, %v1307_v47  ;;  %v1174_v55 = vmul.f32 %v2566_v17, %v777_v51  ;;  %v1206_v56 = vmul.f32 %v2566_v17, %v905_v52  ;;  %v779_v57 = vpop.f32.mrb[41].mxu0  ;;  %v907_v58 = vpop.f32.mrb[41].mxu1 }
 0x166   :  { %v2027_v54 = vpack.c.bf16 %v1340_v50, %v1339_v48  ;;  %v780_v59 = vpop.f32.mrb[42].mxu0  ;;  %v908_v60 = vpop.f32.mrb[42].mxu1 }
 0x167   :  { %2067 = vst [vmem:[#allocation3 + $0x48] sm:$0xff] %v1947_v53   ;;  %v1245_v61 = vadd.f32 %v2571_v19, %v1174_v55  ;;  %v1277_v62 = vadd.f32 %v2571_v19, %v1206_v56  ;;  %v1175_v63 = vmul.f32 %v2566_v17, %v780_v59  ;;  %v1207_v0 = vmul.f32 %v2566_v17, %v908_v60  ;;  %v782_v1 = vpop.f32.mrb[43].mxu0  ;;  %v910_v2 = vpop.f32.mrb[43].mxu1 }
 0x168   :  { %2083 = vst [vmem:[#allocation3 + $0xc8] sm:$0xff] %v2027_v54  }
 0x169   :  { %v1246_v3 = vadd.f32 %v2571_v19, %v1175_v63  ;;  %v1278_v4 = vadd.f32 %v2571_v19, %v1207_v0  ;;  %v1309_v5 = vmax.f32 %v1245_v61, 0.0  ;;  %v1341_v6 = vmax.f32 %v1277_v62, 0.0 }
 0x16b   :  { %v1310_v7 = vmax.f32 %v1246_v3, 0.0  ;;  %v1342_v8 = vmax.f32 %v1278_v4, 0.0 }
 0x16c   :  { %v785_v9 = vpop.f32.mrb[44].mxu0  ;;  %v913_v10 = vpop.f32.mrb[44].mxu1 }
 0x16d   :  { %v1952_v11 = vpack.c.bf16 %v1310_v7, %v1309_v5  ;;  %v2032_v12 = vpack.c.bf16 %v1342_v8, %v1341_v6  ;;  %v1176_v13 = vmul.f32 %v2566_v17, %v785_v9  ;;  %v1208_v14 = vmul.f32 %v2566_v17, %v913_v10  ;;  %v787_v15 = vpop.f32.mrb[45].mxu0  ;;  %v915_v16 = vpop.f32.mrb[45].mxu1 }
 0x16e   :  { %v788_v18 = vpop.f32.mrb[46].mxu0  ;;  %v916_v20 = vpop.f32.mrb[46].mxu1 }
 0x16f   :  { %2068 = vst [vmem:[#allocation3 + $0x50] sm:$0xff] %v1952_v11   ;;  %2084 = vst [vmem:[#allocation3 + $0xd0] sm:$0xff] %v2032_v12   ;;  %v1247_v21 = vadd.f32 %v2571_v19, %v1176_v13  ;;  %v1279_v22 = vadd.f32 %v2571_v19, %v1208_v14  ;;  %v1177_v23 = vmul.f32 %v2566_v17, %v788_v18  ;;  %v790_v25 = vpop.f32.mrb[47].mxu0  ;;  %v918_v26 = vpop.f32.mrb[47].mxu1 }
 0x170   :  { %v1209_v24 = vmul.f32 %v2566_v17, %v916_v20 }
 0x171   :  { %v1248_v27 = vadd.f32 %v2571_v19, %v1177_v23  ;;  %v1311_v29 = vmax.f32 %v1247_v21, 0.0  ;;  %v1343_v30 = vmax.f32 %v1279_v22, 0.0 }
 0x172   :  { %v1280_v28 = vadd.f32 %v2571_v19, %v1209_v24 }
 0x173   :  { %v1312_v31 = vmax.f32 %v1248_v27, 0.0 }
 0x174   :  { %v1344_v32 = vmax.f32 %v1280_v28, 0.0  ;;  %v793_v33 = vpop.f32.mrb[48].mxu0  ;;  %v921_v34 = vpop.f32.mrb[48].mxu1 }
 0x175   :  { %v1957_v35 = vpack.c.bf16 %v1312_v31, %v1311_v29  ;;  %v1178_v37 = vmul.f32 %v2566_v17, %v793_v33  ;;  %v1210_v38 = vmul.f32 %v2566_v17, %v921_v34  ;;  %v795_v39 = vpop.f32.mrb[49].mxu0  ;;  %v923_v40 = vpop.f32.mrb[49].mxu1 }
 0x176   :  { %v2037_v36 = vpack.c.bf16 %v1344_v32, %v1343_v30  ;;  %v796_v41 = vpop.f32.mrb[50].mxu0  ;;  %v924_v42 = vpop.f32.mrb[50].mxu1 }
 0x177   :  { %2069 = vst [vmem:[#allocation3 + $0x58] sm:$0xff] %v1957_v35   ;;  %v1249_v43 = vadd.f32 %v2571_v19, %v1178_v37  ;;  %v1281_v44 = vadd.f32 %v2571_v19, %v1210_v38  ;;  %v1179_v45 = vmul.f32 %v2566_v17, %v796_v41  ;;  %v1211_v46 = vmul.f32 %v2566_v17, %v924_v42  ;;  %v798_v47 = vpop.f32.mrb[51].mxu0  ;;  %v926_v48 = vpop.f32.mrb[51].mxu1 }
 0x178   :  { %2085 = vst [vmem:[#allocation3 + $0xd8] sm:$0xff] %v2037_v36  }
 0x179   :  { %v1250_v49 = vadd.f32 %v2571_v19, %v1179_v45  ;;  %v1282_v50 = vadd.f32 %v2571_v19, %v1211_v46  ;;  %v1313_v51 = vmax.f32 %v1249_v43, 0.0  ;;  %v1345_v52 = vmax.f32 %v1281_v44, 0.0 }
 0x17b   :  { %v1314_v53 = vmax.f32 %v1250_v49, 0.0  ;;  %v1346_v54 = vmax.f32 %v1282_v50, 0.0 }
 0x17c   :  { %v801_v55 = vpop.f32.mrb[52].mxu0  ;;  %v929_v56 = vpop.f32.mrb[52].mxu1 }
 0x17d   :  { %v1962_v57 = vpack.c.bf16 %v1314_v53, %v1313_v51  ;;  %v2042_v58 = vpack.c.bf16 %v1346_v54, %v1345_v52  ;;  %v1180_v59 = vmul.f32 %v2566_v17, %v801_v55  ;;  %v1212_v60 = vmul.f32 %v2566_v17, %v929_v56  ;;  %v803_v61 = vpop.f32.mrb[53].mxu0  ;;  %v931_v62 = vpop.f32.mrb[53].mxu1 }
 0x17e   :  { %v804_v63 = vpop.f32.mrb[54].mxu0  ;;  %v932_v0 = vpop.f32.mrb[54].mxu1 }
 0x17f   :  { %2070 = vst [vmem:[#allocation3 + $0x60] sm:$0xff] %v1962_v57   ;;  %2086 = vst [vmem:[#allocation3 + $0xe0] sm:$0xff] %v2042_v58   ;;  %v1251_v1 = vadd.f32 %v2571_v19, %v1180_v59  ;;  %v1283_v2 = vadd.f32 %v2571_v19, %v1212_v60  ;;  %v1181_v3 = vmul.f32 %v2566_v17, %v804_v63  ;;  %v806_v5 = vpop.f32.mrb[55].mxu0  ;;  %v934_v6 = vpop.f32.mrb[55].mxu1 }
 0x180   :  { %v1213_v4 = vmul.f32 %v2566_v17, %v932_v0 }
 0x181   :  { %v1252_v7 = vadd.f32 %v2571_v19, %v1181_v3  ;;  %v1315_v9 = vmax.f32 %v1251_v1, 0.0  ;;  %v1347_v10 = vmax.f32 %v1283_v2, 0.0 }
 0x182   :  { %v1284_v8 = vadd.f32 %v2571_v19, %v1213_v4 }
 0x183   :  { %v1316_v11 = vmax.f32 %v1252_v7, 0.0 }
 0x184   :  { %v1348_v12 = vmax.f32 %v1284_v8, 0.0  ;;  %v809_v13 = vpop.f32.mrb[56].mxu0  ;;  %v937_v14 = vpop.f32.mrb[56].mxu1 }
 0x185   :  { %v1967_v15 = vpack.c.bf16 %v1316_v11, %v1315_v9  ;;  %v1182_v18 = vmul.f32 %v2566_v17, %v809_v13  ;;  %v1214_v20 = vmul.f32 %v2566_v17, %v937_v14  ;;  %v811_v21 = vpop.f32.mrb[57].mxu0  ;;  %v939_v22 = vpop.f32.mrb[57].mxu1 }
 0x186   :  { %v2047_v16 = vpack.c.bf16 %v1348_v12, %v1347_v10  ;;  %v812_v23 = vpop.f32.mrb[58].mxu0  ;;  %v940_v24 = vpop.f32.mrb[58].mxu1 }
 0x187   :  { %2071 = vst [vmem:[#allocation3 + $0x68] sm:$0xff] %v1967_v15   ;;  %v1253_v25 = vadd.f32 %v2571_v19, %v1182_v18  ;;  %v1285_v26 = vadd.f32 %v2571_v19, %v1214_v20  ;;  %v1183_v27 = vmul.f32 %v2566_v17, %v812_v23  ;;  %v1215_v28 = vmul.f32 %v2566_v17, %v940_v24  ;;  %v814_v29 = vpop.f32.mrb[59].mxu0  ;;  %v942_v30 = vpop.f32.mrb[59].mxu1 }
 0x188   :  { %2087 = vst [vmem:[#allocation3 + $0xe8] sm:$0xff] %v2047_v16  }
 0x189   :  { %v1254_v31 = vadd.f32 %v2571_v19, %v1183_v27  ;;  %v1286_v32 = vadd.f32 %v2571_v19, %v1215_v28  ;;  %v1317_v33 = vmax.f32 %v1253_v25, 0.0  ;;  %v1349_v34 = vmax.f32 %v1285_v26, 0.0 }
 0x18b   :  { %v1318_v35 = vmax.f32 %v1254_v31, 0.0  ;;  %v1350_v36 = vmax.f32 %v1286_v32, 0.0 }
 0x18c   :  { %v817_v37 = vpop.f32.mrb[60].mxu0  ;;  %v945_v38 = vpop.f32.mrb[60].mxu1 }
 0x18d   :  { %v1972_v39 = vpack.c.bf16 %v1318_v35, %v1317_v33  ;;  %v2052_v40 = vpack.c.bf16 %v1350_v36, %v1349_v34  ;;  %v1184_v41 = vmul.f32 %v2566_v17, %v817_v37  ;;  %v1216_v42 = vmul.f32 %v2566_v17, %v945_v38  ;;  %v819_v43 = vpop.f32.mrb[61].mxu0  ;;  %v947_v44 = vpop.f32.mrb[61].mxu1 }
 0x18e   :  { %v820_v45 = vpop.f32.mrb[62].mxu0  ;;  %v948_v46 = vpop.f32.mrb[62].mxu1 }
 0x18f   :  { %2072 = vst [vmem:[#allocation3 + $0x70] sm:$0xff] %v1972_v39   ;;  %2088 = vst [vmem:[#allocation3 + $0xf0] sm:$0xff] %v2052_v40   ;;  %v1255_v47 = vadd.f32 %v2571_v19, %v1184_v41  ;;  %v1287_v48 = vadd.f32 %v2571_v19, %v1216_v42  ;;  %v1185_v49 = vmul.f32 %v2566_v17, %v820_v45  ;;  %v822_v51 = vpop.f32.mrb[63].mxu0  ;;  %v950_v52 = vpop.f32.mrb[63].mxu1 }
 0x190   :  { %v1217_v50 = vmul.f32 %v2566_v17, %v948_v46 }
 0x191   :  { %v1256_v53 = vadd.f32 %v2571_v19, %v1185_v49  ;;  %v1319_v55 = vmax.f32 %v1255_v47, 0.0  ;;  %v1351_v56 = vmax.f32 %v1287_v48, 0.0 }
 0x192   :  { %v1288_v54 = vadd.f32 %v2571_v19, %v1217_v50 }
 0x193   :  { %v1320_v57 = vmax.f32 %v1256_v53, 0.0 }
 0x194   :  { %v1352_v58 = vmax.f32 %v1288_v54, 0.0 }
 0x195   :  { %v1977_v59 = vpack.c.bf16 %v1320_v57, %v1319_v55 }
 0x196   :  { %v2057_v60 = vpack.c.bf16 %v1352_v58, %v1351_v56 }
 0x197   :  { %2073 = vst [vmem:[#allocation3 + $0x78] sm:$0xff] %v1977_v59  }
 0x198   :  { %2089 = vst [vmem:[#allocation3 + $0xf8] sm:$0xff] %v2057_v60  }
 0x199   :  { %2249 = shalt.err (!%p2246_p4)
}
 0x19a   :  { %s2250_s20 = scalar_lea.hbm %s2717_s4, 4096 }
 0x19b   :  { %p2251_p5 = scmp.ne.s32.totalorder %s2717_s4, %s2250_s20  ;;  %p2254_p6 = scmp.lt.u32.totalorder %s2250_s20, %s2717_s4 }
 0x19d   :  { %p2256_p7 = pnand %p2254_p6, %p2251_p5 }
 0x19f   :  { %2259 = shalt.err (!%p2256_p7)
}
 0x1a0   :  { %s2264_s25 = smov 64   ;;  %s2265_s26 = smov 4  }
 0x1a1   :  { %1684 = dma.vmem_to_hbm [thread:$0]  %s1679_s2, 4096, %s2717_s4, [#allocation4], %s2264_s25, %s2264_s25, %s2265_s26  }
 0x1a2   :  { %2260 = dma.done.wait [#allocation4], 4096  }
 0x1a3   :  { %2261 = vsyncadd [#allocation4], 4294963200 }
 0x1a4   :  { %1688 = vsyncpa [#allocation4], 1 }

</bundles_post_ra>
